<compile_context>
chip_gen: v6e
topology: v6e:2x2x1
jax: 0.10.0
libtpu: 0.0.40
codegen_flags: <defaults>
</compile_context>

<pallas_src>
import jax
import jax.numpy as jnp
from jax.experimental import pallas as pl
from jax.experimental.pallas import tpu as pltpu

LANE = 128


def _round_up(x, m):
    return -(-x // m) * m


def _vmem_capacity_bytes():
    try:
        return int(pltpu.get_tpu_info().vmem_capacity_bytes)
    except Exception:
        return 128 * 1024 * 1024  # v5e/v6e default


# --------------------------------------------------------------------------
# Fused single-pass kernel: whole per-batch slab resident in VMEM.
# --------------------------------------------------------------------------
def _cam_fused_kernel(gamma_ref, x_ref, o_ref):
    # gamma_ref: SMEM (1,) f32; x_ref / o_ref: (1, C, HWp) native dtype.
    xt = x_ref[0]                                          # (C, HWp)
    # Gram matrix E = x @ x^T, f32 accumulation on the MXU.
    energy = jax.lax.dot_general(
        xt, xt, dimension_numbers=(((1,), (1,)), ((), ())),
        preferred_element_type=jnp.float32)                # (C, C) f32
    # softmax(rowmax(E) - E) == exp(rowmin(E) - E) / sum   (single reduction)
    e_min = jnp.min(energy, axis=-1, keepdims=True)
    p = jnp.exp(e_min - energy)
    denom = jnp.sum(p, axis=-1, keepdims=True)
    # Fold gamma into the attention matrix: gamma*(A@x) == (gamma*A)@x.
    att = (gamma_ref[0] * (p / denom)).astype(xt.dtype)    # (C, C) native dtype
    out = jax.lax.dot_general(
        att, xt, dimension_numbers=(((1,), (0,)), ((), ())),
        preferred_element_type=jnp.float32)                # (C, HWp) f32
    o_ref[0] = out.astype(o_ref.dtype) + xt


# --------------------------------------------------------------------------
# Tiled two-pass fallback (slab does not fit VMEM).
# --------------------------------------------------------------------------
def _attention_kernel(gamma_ref, x_ref, att_ref, energy_acc):
    # gamma_ref: SMEM (1,) f32; x_ref: (1, C, THW); att_ref: (1, C, C);
    # energy_acc: (C, C) f32 scratch, persists across the HW-tile axis.
    t = pl.program_id(1)

    @pl.when(t == 0)
    def _():
        energy_acc[...] = jnp.zeros_like(energy_acc)

    xt = x_ref[0]
    energy_acc[...] += jax.lax.dot_general(
        xt, xt, dimension_numbers=(((1,), (1,)), ((), ())),
        preferred_element_type=jnp.float32)

    @pl.when(t == pl.num_programs(1) - 1)
    def _():
        energy = energy_acc[...]
        e_min = jnp.min(energy, axis=-1, keepdims=True)
        p = jnp.exp(e_min - energy)
        denom = jnp.sum(p, axis=-1, keepdims=True)
        # gamma folded in here, once per batch (O(C^2) instead of O(C*HW)).
        att_ref[0] = (gamma_ref[0] * (p / denom)).astype(att_ref.dtype)


def _apply_kernel(att_ref, x_ref, o_ref):
    # att_ref: (1, C, C) (already gamma-scaled); x_ref / o_ref: (1, C, THW).
    xt = x_ref[0]
    out = jax.lax.dot_general(
        att_ref[0], xt, dimension_numbers=(((1,), (0,)), ((), ())),
        preferred_element_type=jnp.float32)
    o_ref[0] = out.astype(o_ref.dtype) + xt


# --------------------------------------------------------------------------
# Sizing helpers (per-generation, driven by VMEM capacity).
# --------------------------------------------------------------------------
def _choose_hw_tile(C, HW, itemsize, vmem_cap):
    """Pick an HW tile (multiple of 128) minimizing padding + per-step overhead."""
    hw_lane = _round_up(HW, LANE)
    if vmem_cap >= (96 << 20):            # v5e / v6e class (128 MiB VMEM)
        tile_budget, lane_cap = 16 << 20, 8192
    else:                                  # v7x class (64 MiB VMEM)
        tile_budget, lane_cap = 8 << 20, 4096
    max_thw = (tile_budget // max(1, C * itemsize)) // LANE * LANE
    max_thw = max(LANE, min(lane_cap, max_thw))
    if hw_lane <= max_thw:
        return hw_lane, hw_lane
    # Cost model: padded length (extra FLOPs/DMA) + per-grid-step overhead,
    # expressed in "equivalent lanes" (~0.35us/step vs ~2ns/lane at C=512 bf16).
    OVERHEAD_LANES = 256
    best = None
    for thw in range(max_thw, LANE - 1, -LANE):
        padded = _round_up(hw_lane, thw)
        cost = padded + (padded // thw) * OVERHEAD_LANES
        if best is None or cost < best[0]:
            best = (cost, thw, padded)
    return best[1], best[2]


def _fused_vmem_need(C, hw_lane, itemsize):
    slab = C * hw_lane * itemsize
    # 2x double-buffered input slab + 2x output slab + f32 apply temp + softmax temps.
    return 4 * slab + C * hw_lane * 4 + 4 * C * C * 4


def _tiled_vmem_need(C, thw, itemsize):
    x_tile = C * thw * itemsize
    att = C * C * itemsize
    acc = C * C * 4
    return 4 * x_tile + 2 * att + acc + C * thw * 4


def _vmem_limit(need_bytes, vmem_cap):
    cap = (vmem_cap * 3) // 4             # ~48 MiB on v7x, ~96 MiB on v5e/v6e
    return int(max(16 << 20, min(int(need_bytes * 1.25) + (4 << 20), cap)))


# --------------------------------------------------------------------------
# Public wrapper.
# --------------------------------------------------------------------------
def cam_module(x, gamma, *, force_tiled=False):
    """Channel attention: out = gamma * (softmax(rowmax(E) - E) @ x_flat) + x."""
    B, C, H, W = x.shape
    HW = H * W
    itemsize = jnp.dtype(x.dtype).itemsize
    vmem_cap = _vmem_capacity_bytes()
    hw_lane = _round_up(HW, LANE)
    gamma = jnp.asarray(gamma, jnp.float32).reshape((1,))

    x_flat = x.reshape(B, C, HW)

    fused_need = _fused_vmem_need(C, hw_lane, itemsize)
    use_fused = (not force_tiled) and fused_need <= (vmem_cap * 11) // 20

    if use_fused:
        # Single pass: x read from HBM once per batch; attention stays in VMEM.
        if hw_lane != HW:
            # Zero padding is exact: zero HW columns add nothing to E and the
            # padded output columns are sliced away below.
            x_flat = jnp.pad(x_flat, ((0, 0), (0, 0), (0, hw_lane - HW)))
        out_flat = pl.pallas_call(
            _cam_fused_kernel,
            out_shape=jax.ShapeDtypeStruct((B, C, hw_lane), x.dtype),
            grid_spec=pltpu.PrefetchScalarGridSpec(
                num_scalar_prefetch=0,
                grid=(B,),
                in_specs=[
                    pl.BlockSpec(memory_space=pltpu.MemorySpace.SMEM),   # gamma
                    pl.BlockSpec((1, C, hw_lane), lambda b: (b, 0, 0)),  # x slab
                ],
                out_specs=pl.BlockSpec((1, C, hw_lane), lambda b: (b, 0, 0)),
            ),
            compiler_params=pltpu.CompilerParams(
                dimension_semantics=("parallel",),
                vmem_limit_bytes=_vmem_limit(fused_need, vmem_cap),
            ),
        )(gamma, x_flat)
        if hw_lane != HW:
            out_flat = out_flat[:, :, :HW]
        return out_flat.reshape(B, C, H, W)

    # ---- Tiled two-pass fallback ----
    thw, hw_pad = _choose_hw_tile(C, HW, itemsize, vmem_cap)
    nt = hw_pad // thw
    if hw_pad != HW:
        x_flat = jnp.pad(x_flat, ((0, 0), (0, 0), (0, hw_pad - HW)))
    vmem_limit = _vmem_limit(_tiled_vmem_need(C, thw, itemsize), vmem_cap)

    # Pass 1: gamma-scaled attention (B, C, C), HW-tiled energy accumulation.
    attention = pl.pallas_call(
        _attention_kernel,
        out_shape=jax.ShapeDtypeStruct((B, C, C), x.dtype),
        grid_spec=pltpu.PrefetchScalarGridSpec(
            num_scalar_prefetch=0,
            grid=(B, nt),
            in_specs=[
                pl.BlockSpec(memory_space=pltpu.MemorySpace.SMEM),       # gamma
                pl.BlockSpec((1, C, thw), lambda b, t: (b, 0, t)),       # x
            ],
            out_specs=pl.BlockSpec((1, C, C), lambda b, t: (b, 0, 0)),
            scratch_shapes=[pltpu.VMEM((C, C), jnp.float32)],
        ),
        compiler_params=pltpu.CompilerParams(
            dimension_semantics=("parallel", "arbitrary"),
            vmem_limit_bytes=vmem_limit,
        ),
    )(gamma, x_flat)

    # Pass 2: out = (gamma*A) @ x_tile + x_tile, tiled over HW.
    out_flat = pl.pallas_call(
        _apply_kernel,
        out_shape=jax.ShapeDtypeStruct((B, C, hw_pad), x.dtype),
        grid_spec=pltpu.PrefetchScalarGridSpec(
            num_scalar_prefetch=0,
            grid=(B, nt),
            in_specs=[
                pl.BlockSpec((1, C, C), lambda b, t: (b, 0, 0)),         # attention
                pl.BlockSpec((1, C, thw), lambda b, t: (b, 0, t)),       # x
            ],
            out_specs=pl.BlockSpec((1, C, thw), lambda b, t: (b, 0, t)),
        ),
        compiler_params=pltpu.CompilerParams(
            dimension_semantics=("parallel", "parallel"),
            vmem_limit_bytes=vmem_limit,
        ),
    )(attention, x_flat)

    if hw_pad != HW:
        out_flat = out_flat[:, :, :HW]
    return out_flat.reshape(B, C, H, W)


# --------------------------------------------------------------------------
# Reference + self-test.
# --------------------------------------------------------------------------
def cam_reference(x, gamma):
    B, C, H, W = x.shape
    xf = x.reshape(B, C, H * W).astype(jnp.float32)
    energy = jnp.einsum("bcn,bdn->bcd", xf, xf, precision="highest")
    energy_new = jnp.max(energy, axis=-1, keepdims=True) - energy
    attention = jax.nn.softmax(energy_new, axis=-1)
    out = jnp.einsum("bcd,bdn->bcn", attention, xf,
                     precision="highest").reshape(B, C, H, W)
    return gamma * out + x.astype(jnp.float32)


if __name__ == "__main__":
    B, C, H, W = 2, 4, 16, 16
    key = jax.random.PRNGKey(0)
    # Moderate-magnitude inputs keep the channel softmax out of the near-one-hot
    # regime where matmul rounding differences are amplified exponentially.
    x = 0.1 * jax.random.normal(key, (B, C, H, W), dtype=jnp.float32)

    gamma0 = jnp.zeros((1,), jnp.float32)   # matches nn.Parameter(torch.zeros(1))
    gamma1 = jnp.array([0.5], jnp.float32)  # nonzero so the attention path runs

    # Fused (slab-resident) path.
    out0 = jax.block_until_ready(cam_module(x, gamma0))
    out1 = jax.block_until_ready(cam_module(x, gamma1))
    ref0 = cam_reference(x, gamma0)
    ref1 = cam_reference(x, gamma1)
    assert jnp.allclose(out0, ref0, atol=1e-5, rtol=1e-5), "gamma=0 path mismatch"
    assert jnp.allclose(out1, ref1, atol=1e-2, rtol=1e-2), "fused f32 path mismatch"

    # Tiled two-pass fallback (forced so it is exercised at small shapes too).
    out1_t = jax.block_until_ready(cam_module(x, gamma1, force_tiled=True))
    assert jnp.allclose(out1_t, ref1, atol=1e-2, rtol=1e-2), "tiled f32 path mismatch"

    # Native bf16 path: bf16 operands go straight to the MXU, softmax stays f32.
    xb = x.astype(jnp.bfloat16)
    outb = jax.block_until_ready(cam_module(xb, gamma1))
    refb = cam_reference(xb, gamma1)
    assert jnp.allclose(outb.astype(jnp.float32), refb, atol=1e-1, rtol=1e-1), \
        "bf16 path mismatch"

    print("KERNEL_OK")
</pallas_src>

<mosaic_0001>
module attributes {stable_mosaic.version = 11 : i64} {
  func.func @_cam_fused_kernel(%arg0: i32, %arg1: memref<1xf32, #tpu.memory_space<smem>>, %arg2: memref<1x4x256xf32, #tpu.memory_space<vmem>>, %arg3: memref<1x4x256xf32, #tpu.memory_space<vmem>>) attributes {dimension_semantics = [#tpu.dimension_semantics<parallel>], iteration_bounds = array<i64: 2>, scalar_prefetch = 0 : i64, scratch_operands = 0 : i64, tpu.core_type = #tpu.core_type<tc>, window_params = [{transform_indices = @transform_0, window_bounds = array<i64: 1>}, {transform_indices = @transform_1, window_bounds = array<i64: 1, 4, 256>}, {transform_indices = @transform_2, window_bounds = array<i64: 1, 4, 256>}]} {
    %c0 = arith.constant 0 : index
    %c0_0 = arith.constant 0 : index
    %c0_1 = arith.constant 0 : index
    %0 = vector.load %arg2[%c0, %c0_0, %c0_1] : memref<1x4x256xf32, #tpu.memory_space<vmem>>, vector<1x4x256xf32>
    %1 = vector.shape_cast %0 : vector<1x4x256xf32> to vector<4x256xf32>
    %cst = arith.constant dense<0.000000e+00> : vector<4x4xf32>
    %2 = tpu.matmul %1, %1, %cst {dimension_numbers = #tpu.dot_dimension_numbers<[1], [1], [0], [0], [0, 0, 1, 0], [], []>} : vector<4x256xf32>, vector<4x256xf32>, vector<4x4xf32> -> vector<4x4xf32>
    %cst_2 = arith.constant dense<0x7F800000> : vector<4xf32>
    %3 = vector.multi_reduction <minimumf>, %2, %cst_2 [1] : vector<4x4xf32> to vector<4xf32>
    %4 = vector.shape_cast %3 : vector<4xf32> to vector<4x1xf32>
    %5 = vector.broadcast %4 : vector<4x1xf32> to vector<4x4xf32>
    %6 = arith.subf %5, %2 : vector<4x4xf32>
    %7 = math.exp %6 : vector<4x4xf32>
    %cst_3 = arith.constant dense<0.000000e+00> : vector<4xf32>
    %8 = vector.multi_reduction <add>, %7, %cst_3 [1] : vector<4x4xf32> to vector<4xf32>
    %9 = vector.shape_cast %8 : vector<4xf32> to vector<4x1xf32>
    %c0_4 = arith.constant 0 : index
    %10 = memref.load %arg1[%c0_4] : memref<1xf32, #tpu.memory_space<smem>>
    %11 = vector.broadcast %9 : vector<4x1xf32> to vector<4x4xf32>
    %12 = arith.divf %7, %11 : vector<4x4xf32>
    %13 = vector.broadcast %10 : f32 to vector<4x4xf32>
    %14 = arith.mulf %13, %12 : vector<4x4xf32>
    %cst_5 = arith.constant dense<0.000000e+00> : vector<4x256xf32>
    %15 = tpu.matmul %14, %1, %cst_5 {dimension_numbers = #tpu.dot_dimension_numbers<[1], [0], [0], [1], [0, 0, 1, 1], [], []>} : vector<4x4xf32>, vector<4x256xf32>, vector<4x256xf32> -> vector<4x256xf32>
    %16 = arith.addf %15, %1 : vector<4x256xf32>
    %c0_6 = arith.constant 0 : index
    %c0_7 = arith.constant 0 : index
    %c0_8 = arith.constant 0 : index
    %17 = vector.load %arg3[%c0_6, %c0_7, %c0_8] : memref<1x4x256xf32, #tpu.memory_space<vmem>>, vector<1x4x256xf32>
    %18 = vector.shape_cast %17 : vector<1x4x256xf32> to vector<4x256xf32>
    %19 = vector.shape_cast %16 : vector<4x256xf32> to vector<1x4x256xf32>
    tpu.vector_store %arg3[%c0_6, %c0_7, %c0_8], %19 {strides = array<i32>} : memref<1x4x256xf32, #tpu.memory_space<vmem>>, vector<1x4x256xf32>,
    return
  }
  func.func @transform_0(%arg0: i32) -> i32 {
    %c0_i32 = arith.constant 0 : i32
    %c0_i32_0 = arith.constant 0 : i32
    return %c0_i32 : i32
  }
  func.func @transform_1(%arg0: i32) -> (i32, i32, i32) {
    %c0_i32 = arith.constant 0 : i32
    %c0_i32_0 = arith.constant 0 : i32
    %c0_i32_1 = arith.constant 0 : i32
    return %arg0, %c0_i32, %c0_i32_0 : i32, i32, i32
  }
  func.func @transform_2(%arg0: i32) -> (i32, i32, i32) {
    %c0_i32 = arith.constant 0 : i32
    %c0_i32_0 = arith.constant 0 : i32
    %c0_i32_1 = arith.constant 0 : i32
    return %arg0, %c0_i32, %c0_i32_0 : i32, i32, i32
  }
}

</mosaic_0001>

<bundles_post_ra>
// kernel: tpu_custom_call.1
= control target key start
LH: loop header
LB: loop body
LE: loop exit
PB: predicated region body
PF: predicated region fallthrough
CT: control target
= control target key end

     0   :  { %s751_s0 = inlined_call_operand.<no memory space> [shape: f32[1], index: 0, kind: input, shape index: {}]   ;;  %s752_s1 = inlined_call_operand.hbm [shape: f32[2,4,256], index: 1, kind: input, shape index: {}]   ;;  %s753_s2 = inlined_call_operand.hbm [shape: f32[2,4,256], index: 2, kind: output, shape index: {}]  }
   0x1   :  { %7 = sst [smem:[#allocation2]] %s751_s0 }
   0x2   :  { %8 = vsyncpa [#allocation4], 0 }
   0x3   :  { %10 = vsyncpa [#allocation4 + $0x1], 0 }
   0x4   :  { %11 = vsyncpa [#allocation5], 0 }
   0x5   :  { %13 = vsyncpa [#allocation5 + $0x1], 0  ;;  %s606_s11 = smov 0   ;;  %s608_s12 = smov 0  }
   0x6   :  { %s610_s13 = smov 0   ;;  %s612_s14 = smov 0  }
   0x7 LB: > { %s627_s0 = sadd.s32 4294967295, %s583_s14   ;;  %s420_s15 = sadd.s32 4294967294, %s583_s14   ;;  %s583_s14 = sphi %s612_s14, %s770_s14   ;;  %s579_s13 = sphi %s610_s13, %s769_s13   ;;  %s575_s12 = sphi %s608_s12, %s768_s12   ;;  %s571_s11 = sphi %s606_s11, %s767_s11  }
   0x8   : > { %s631_s16 = sadd.s32 1, %s583_s14   ;;  %s47_s17 = sadd.s32 1, %s579_s13 }
   0x9   : > { %s44_s18 = ssub.s32 %s583_s14, %s631_s16  ;;  %p54_p0 = scmp.ne.s32.totalorder %s579_s13, %s575_s12 }
   0xa   : > { %p45_p1 = scmp.eq.s32.totalorder %s44_s18, 0  ;;  %p55_p2 = scmp.eq.s32.totalorder %s583_s14, 0 }
   0xb   : > { %p60_p3 = scmp.ne.s32.totalorder %s575_s12, %s571_s11  ;;  %p61_p4 = scmp.eq.s32.totalorder %s627_s0, 0 }
   0xc   : > { %s643_s19 = scalar_select %p45_p1, %s579_s13, %s47_s17  }
   0xd   : > { %p645_p5 = por %p55_p2, %p54_p0  ;;  %p649_p6 = por %p61_p4, %p60_p3 }
   0xe   : > { %p84_p7 = scmp.eq.s32.totalorder %s627_s0, 1  ;;  %p90_p8 = scmp.eq.s32.totalorder %s420_s15, 1 }
   0xf   : > { %s757_s21 = scalar_select %p649_p6, 1, 0 }
  0x10   : > { %p451_p10 = scmp.lt.s32.totalorder %s583_s14, 2  ;;  %p656_p11 = por %p84_p7, %p54_p0 }
  0x11   : > { %p660_p12 = por %p90_p8, %p60_p3  ;;  %s113_s24 = sand.u32 1, %s579_s13  }
  0x12   : > { %s758_s22 = scalar_select %p656_p11, 1, 0 }
  0x13   : > { %s759_s23 = scalar_select %p660_p12, 1, 0 }
  0x14   : > { %s437_s25 = sshll.u32 %s583_s14, 7  ;;  %s423_s26 = sshll.u32 %s113_s24, 3 }
  0x15   : > { %s669_s29 = scalar_lea.hbm %s752_s1, %s437_s25  ;;  %s117_s30 = scalar_lea.vmem [#allocation3], %s423_s26 }
  0x16   : > { %s125_s3 = sshll.u32 %s117_s30, 4  ;;  %p673_p13 = pnand %p451_p10, %p645_p5  ;;  %s677_s3 = int_to_ptr.vmem [resolvable:$true] %s125_s3 }
  0x17   : > { %s114_s5 = scalar_lea.sflag [#allocation4], %s113_s24  ;;  %s491_s6 = scalar_lea.hbm %s669_s29, 128 }
  0x18   : > { %p492_p2 = scmp.ne.s32.totalorder %s669_s29, %s491_s6  ;;  %p493_p3 = pneg %p673_p13 }
  0x19   : > { %s496_s9 = scalar_lea.hbm %s752_s1, 256  ;;  %p497_p5 = scmp.lt.s32.totalorder %s669_s29, %s752_s1 }
  0x1a   : > { %p494_p4 = pnand %p493_p3, %p492_p2  ;;  %p498_p8 = scmp.lt.s32.totalorder %s496_s9, %s491_s6 }
  0x1c   : > { %p495_p7 = pneg %p494_p4  ;;  %p499_p10 = por %p498_p8, %p497_p5 }
  0x1e   : > { %p500_p9 = pnand %p499_p10, %p495_p7 }
  0x20   : > { %503 = shalt.err (!%p500_p9)
}
  0x21   : > { %s504_s17 = scalar_lea.vmem %s677_s3, 128  ;;  %s585_s18 = smov [#allocation3]  }
  0x22   : > { %p505_p0 = scmp.ne.s32.totalorder %s677_s3, %s504_s17  ;;  %s509_s20 = sshll.u32 %s585_s18, 4  ;;  %s510_s20 = int_to_ptr.vmem [resolvable:$false] %s509_s20 }
  0x23   : > { %s511_s24 = scalar_lea.vmem %s510_s20, 256  ;;  %p512_p4 = scmp.lt.s32.totalorder %s677_s3, %s510_s20 }
  0x24   : > { %p507_p1 = pnand %p505_p0, %p493_p3  ;;  %p513_p12 = scmp.lt.s32.totalorder %s511_s24, %s504_s17 }
  0x26   : > { %p508_p2 = pneg %p507_p1  ;;  %p514_p11 = por %p513_p12, %p512_p4 }
  0x28   : > { %p515_p6 = pnand %p514_p11, %p508_p2 }
  0x2a   : > { %518 = shalt.err (!%p515_p6)
}
  0x2b   : > { %446 = dma.hbm_to_vmem [thread:$0]  (!%p673_p13), %s669_s29, 128, %s677_s3, %s114_s5  }
  0x2c   : > { %p761_p9 = scmp.lt.s32.totalorder %s583_s14, 3  ;;  %p762_p7 = scmp.ge.s32.totalorder %s583_s14, 1 }
  0x2e   : > { %p131_p0 = pnand %p762_p7, %p761_p9 }
  0x2f   : > { %s704_s25 = sand.u32 (!%p131_p0), 1, %s575_s12   ;;  %p763_p6 = scmp.ne.s32.totalorder (!%p131_p0), %s757_s21, 0 }
  0x30   : > { %134 = sbr.rel (%p131_p0) target bundleno = 780 (0x30c), region = 28  ;;  %s427_s26 = sshll.u32 (!%p131_p0), %s704_s25, 3 }
  0x31   : > { %s137_s27 = scalar_lea.sflag (!%p131_p0), [#allocation4], %s704_s25  ;;  %s140_s28 = scalar_lea.vmem (!%p131_p0), [#allocation3], %s427_s26 }
  0x35   : > { %562 = dma.done.wait (%p763_p6), %s137_s27, 128  }
  0x36   : > { %564 = vsyncadd (%p763_p6), %s137_s27, 4294967168  ;;  %v161_v0 = vld [vmem:[%s140_s28] sm:$0xff]  ;;  %vm235_vm0 = vcmask 27648   ;;  %vm254_vm1 = vcmask 1043456   ;;  %v586_v10 = vmov 0.0   ;;  %s245_s21 = sld [smem:[#allocation2]] }
  0x37   : > { %v163_v1 = vcombine.high %v161_v0, %v161_v0  ;;  %323 = vmatprep.mubr.f32.mxu1 %v586_v10  ;;  %vm250_vm2 = vcmask 31744   ;;  %s438_s29 = sshll.u32 %s627_s0, 7  ;;  %s160_s30 = scalar_lea.vmem [#allocation6], %s427_s26 }
  0x38   : > { %s350_s3 = sshll.u32 %s160_s30, 4  ;;  %s348_s6 = scalar_lea.hbm %s753_s2, %s438_s29  ;;  %s351_s3 = int_to_ptr.vmem [resolvable:$true] %s350_s3 }
  0x39   : > { %195 = vmatprep.subr.mxu0 %v163_v1  ;;  %229 = vmatprep.mubr.f32.mxu0 %v163_v1  ;;  %s336_s7 = scalar_lea.sflag [#allocation5], %s704_s25  ;;  %s519_s8 = scalar_lea.vmem %s351_s3, 128 }
  0x3a   : > { %196 = vmatpush1.xpose.msra.mxu0 %v161_v0  ;;  %429 = vmatprep.subr.msk.mxu1 %vm254_vm1, %v163_v1  ;;  %p520_p11 = scmp.ne.s32.totalorder %s351_s3, %s519_s8  ;;  %p764_p12 = scmp.ne.s32.totalorder %s758_s22, 0 }
  0x3b   : > { %430 = vmatpush1.msk.msra.mxu1 %vm254_vm1, %v161_v0  ;;  %s587_s9 = smov [#allocation6]  }
  0x3c   : > { %v248_v13 = vstv %s245_s21  ;;  %p521_p13 = pnand %p520_p11, %p764_p12  ;;  %s523_s0 = sshll.u32 %s587_s9, 4  ;;  %s524_s0 = int_to_ptr.vmem [resolvable:$false] %s523_s0 }
  0x3d   : > { %230 = vmatmul.mubr.f32.vlgmr.msra.gmra.mxu0 %v161_v0  ;;  %s525_s10 = scalar_lea.vmem %s524_s0, 256  ;;  %p526_p3 = scmp.lt.s32.totalorder %s351_s3, %s524_s0 }
  0x3e   : > { %p522_p1 = pneg %p521_p13  ;;  %p527_p5 = scmp.lt.s32.totalorder %s525_s10, %s519_s8 }
  0x40   : > { %p528_p8 = por %p527_p5, %p526_p3 }
  0x42   : > { %p529_p10 = pnand %p528_p8, %p522_p1 }
  0xfd   : > { %v231_v2 = vpop.f32.mrf.mxu0 }
  0xfe   : > { %v236_v3 = vsel %vm235_vm0, %v231_v2, inf }
  0xff   : > { %237 = vmin.xlane.f32.xlu0 %v236_v3  ;;  %v233_v4 = vpop.f32.mrf.mxu0 }
 0x188   : > { %v238_v5 = vpop.xlane.xlu0 %237 }
 0x189   : > { %v239_v6 = vsub.f32 %v238_v5, %v231_v2 }
 0x18b   : > { %v240_v7 = vmul.f32 1.442695, %v239_v6 }
 0x18d   : > { %487 = vpow2.f32 %v240_v7 }
 0x19a   : > { %v488_v8 = vpop.eup %487 }
 0x19b   : > { %v242_v9 = vsel %vm235_vm0, %v488_v8, 0.0 }
 0x19c   : > { %243 = vadd.xlane.f32.xlu0 %v242_v9 }
 0x225   : > { %v244_v11 = vpop.xlane.xlu0 %243 }
 0x226   : > { %489 = vrcp.f32 %v244_v11 }
 0x233   : > { %v490_v12 = vpop.eup %489 }
 0x234   : > { %v247_v14 = vmul.f32 %v490_v12, %v488_v8 }
 0x236   : > { %v249_v15 = vmul.f32 %v248_v13, %v247_v14 }
 0x238   : > { %431 = vmatmul.mubr.msk.f32.vlgmr.msra.gmra.mxu1 %vm250_vm2, %v249_v15 }
 0x2f8   : > { %v325_v16 = vpop.f32.mrf.mxu1 }
 0x2f9   : > { %v326_v18 = vadd.f32 %v325_v16, %v161_v0 }
 0x2fa   : > { %v327_v17 = vpop.f32.mrf.mxu1 }
 0x2fb   : > { %v328_v19 = vadd.f32 %v327_v17, %v163_v1 }
 0x2fd   : > { %v332_v20 = vcombine.low %v326_v18, %v328_v19 }
 0x2ff   : > { %334 = vst [vmem:[%s160_s30] sm:$0xff] %v332_v20 }
 0x300   : > { %532 = shalt.err (!%p529_p10)
}
 0x301   : > { %s533_s15 = scalar_lea.hbm %s348_s6, 128  ;;  %s537_s20 = scalar_lea.hbm %s753_s2, 256 }
 0x302   : > { %p534_p2 = scmp.ne.s32.totalorder %s348_s6, %s533_s15  ;;  %p538_p7 = scmp.lt.s32.totalorder %s348_s6, %s753_s2 }
 0x303   : > { %p539_p0 = scmp.lt.s32.totalorder %s537_s20, %s533_s15 }
 0x304   : > { %p535_p4 = pnand %p534_p2, %p764_p12 }
 0x305   : > { %p540_p6 = por %p539_p0, %p538_p7 }
 0x306   : > { %p536_p9 = pneg %p535_p4 }
 0x308   : > { %p541_p11 = pnand %p540_p6, %p536_p9 }
 0x30a   : > { %544 = shalt.err (!%p541_p11)
}
 0x30b   : > { %441 = dma.vmem_to_hbm [thread:$0]  (%p764_p12), %s351_s3, 128, %s348_s6, %s336_s7  }
 0x30c PF: > { %s362_s26 = sand.u32 1, %s571_s11   ;;  %p765_p13 = scmp.ne.s32.totalorder %s759_s23, 0 }
 0x30d   : > { %p766_p1 = scmp.ge.s32.totalorder %s583_s14, 2  ;;  %s363_s27 = scalar_lea.sflag [#allocation5], %s362_s26 }
 0x30f   : > { %p448_p3 = pnand %p766_p1, %p765_p13 }
 0x311   : > { %p449_p5 = pneg %p448_p3 }
 0x313   : > { %566 = dma.done.wait (%p449_p5), %s363_s27, 128  }
 0x314   : > { %568 = vsyncadd (%p449_p5), %s363_s27, 4294967168  ;;  %p16_p8 = scmp.ge.s32.totalorder %s631_s16, 4   ;;  %s767_s11 = smov %s575_s12 }
 0x315   : > { %s768_s12 = smov %s579_s13  ;;  %s769_s13 = smov %s643_s19 }
 0x316   : > { %s770_s14 = smov %s631_s16  ;;  %18 = sbr.rel (!%p16_p8) target bundleno = 7 (0x7), region = 73 }
 0x31b   :  { %368 = vsyncpa [#allocation4], 1 }
 0x31c   :  { %370 = vsyncpa [#allocation4 + $0x1], 1 }
 0x31d   :  { %371 = vsyncpa [#allocation5], 1 }
 0x31e   :  { %373 = vsyncpa [#allocation5 + $0x1], 1 }

</bundles_post_ra>
